<compile_context>
chip_gen: v5e
topology: v5e:2x2
jax: 0.10.0
libtpu: 0.0.40
codegen_flags: <defaults>
</compile_context>

<pallas_src>
import jax
import jax.numpy as jnp
from jax.experimental import pallas as pl
from jax.experimental.pallas import tpu as pltpu


def vae_encoder_kernel(x_ref, w1_ref, b1_ref, w23_ref, b23_ref, eps_ref,
                       z_ref, kl_ref):
    x = x_ref[...]                                                      # [TB, D_in]
    # linear1 + ReLU (MXU matmul, f32 accumulate)
    h = jnp.dot(x, w1_ref[...], preferred_element_type=jnp.float32) + b1_ref[...]
    h = jnp.maximum(h, 0.0)                                             # [TB, H]
    # fused linear2|linear3 -> [mu | s3] in one MXU pass
    ms = jnp.dot(h, w23_ref[...], preferred_element_type=jnp.float32) + b23_ref[...]
    L = ms.shape[-1] // 2
    mu = ms[:, :L]                                                      # [TB, L]
    s3 = ms[:, L:]                                                      # [TB, L]
    sigma = jnp.exp(s3)
    # reparameterization: z = mu + sigma * eps
    z_ref[...] = (mu + sigma * eps_ref[...]).astype(z_ref.dtype)
    # KL per-row partial sum; log(sigma) == s3 algebraically, so use s3 directly.
    kl_ref[...] = jnp.sum(sigma * sigma + mu * mu - s3 - 0.5,
                          axis=-1, keepdims=True).astype(kl_ref.dtype)


def _round_up(n, m):
    return ((n + m - 1) // m) * m


def variational_encoder(x, params, eps, *, block_b=None):
    """x: [B, D_in] f32; params: W1,b1,W2,b2,W3,b3; eps: [B, L] f32 ~ N(0,1)."""
    B, D_in = x.shape
    H = params["W1"].shape[1]
    L = params["W2"].shape[1]

    # Fuse the mu / sigma projections into one [H, 2L] weight (and [1, 2L] bias).
    W23 = jnp.concatenate([params["W2"], params["W3"]], axis=1)
    b23 = jnp.concatenate([params["b2"], params["b3"]], axis=1)

    if block_b is None:
        # Large batch tile amortizes the ~0.35 us/step fixed cost; 512 rows of f32
        # x/eps/z double-buffered plus resident weights stay far below the 32 MiB
        # limit set below (v7x-safe: 64 MiB physical VMEM).
        block_b = min(512, _round_up(B, 8))
    TB = block_b
    B_pad = _round_up(B, TB)
    if B_pad != B:
        pad = B_pad - B
        x = jnp.pad(x, ((0, pad), (0, 0)))
        eps = jnp.pad(eps, ((0, pad), (0, 0)))
    nb = B_pad // TB

    z, kl_rows = pl.pallas_call(
        vae_encoder_kernel,
        out_shape=(
            jax.ShapeDtypeStruct((B_pad, L), x.dtype),
            jax.ShapeDtypeStruct((B_pad, 1), jnp.float32),
        ),
        grid=(nb,),
        in_specs=[
            pl.BlockSpec((TB, D_in), lambda i: (i, 0)),     # x     : tiled over batch
            pl.BlockSpec((D_in, H), lambda i: (0, 0)),      # W1    : resident in VMEM
            pl.BlockSpec((1, H), lambda i: (0, 0)),         # b1    : resident
            pl.BlockSpec((H, 2 * L), lambda i: (0, 0)),     # W2|W3 : resident
            pl.BlockSpec((1, 2 * L), lambda i: (0, 0)),     # b2|b3 : resident
            pl.BlockSpec((TB, L), lambda i: (i, 0)),        # eps   : tiled over batch
        ],
        out_specs=(
            pl.BlockSpec((TB, L), lambda i: (i, 0)),        # z
            pl.BlockSpec((TB, 1), lambda i: (i, 0)),        # per-row KL partials
        ),
        compiler_params=pltpu.CompilerParams(
            dimension_semantics=("parallel",),              # v7x: shard batch over 2 TCs
            vmem_limit_bytes=32 * 1024 * 1024,
        ),
    )(x, params["W1"], params["b1"], W23, b23, eps)

    # Drop padded rows; final tiny scalar reduction is free in XLA.
    return z[:B], jnp.sum(kl_rows[:B, 0])


def init_params(key, input_dims, hidden_dims, latent_dims):
    """Deterministic init mimicking nn.Linear's U(-1/sqrt(fan_in), 1/sqrt(fan_in))."""
    ks = jax.random.split(key, 6)

    def linear(kw, kb, fan_in, fan_out):
        bound = 1.0 / jnp.sqrt(fan_in)
        W = jax.random.uniform(kw, (fan_in, fan_out), jnp.float32, -bound, bound)
        b = jax.random.uniform(kb, (1, fan_out), jnp.float32, -bound, bound)
        return W, b

    W1, b1 = linear(ks[0], ks[1], input_dims, hidden_dims)
    W2, b2 = linear(ks[2], ks[3], hidden_dims, latent_dims)
    W3, b3 = linear(ks[4], ks[5], hidden_dims, latent_dims)
    return {"W1": W1, "b1": b1, "W2": W2, "b2": b2, "W3": W3, "b3": b3}


def reference_forward(x, params, eps):
    h = jnp.maximum(x @ params["W1"] + params["b1"], 0.0)
    mu = h @ params["W2"] + params["b2"]
    sigma = jnp.exp(h @ params["W3"] + params["b3"])
    z = mu + sigma * eps
    kl = jnp.sum(sigma ** 2 + mu ** 2 - jnp.log(sigma) - 0.5)
    return z, kl


if __name__ == "__main__":
    # Small shapes consistent with the module's MLP forward.
    # B=13 + block_b=8 exercises both the batch grid (2 tiles) and row padding.
    B, INPUT_DIMS, HIDDEN_DIMS, LATENT_DIMS = 13, 32, 64, 16

    key = jax.random.PRNGKey(0)
    k_x, k_p, k_eps = jax.random.split(key, 3)

    x = jax.random.normal(k_x, (B, INPUT_DIMS), jnp.float32)
    params = init_params(k_p, INPUT_DIMS, HIDDEN_DIMS, LATENT_DIMS)
    eps = jax.random.normal(k_eps, (B, LATENT_DIMS), jnp.float32)  # N(0,1) sample

    z, kl = variational_encoder(x, params, eps, block_b=8)
    z = jax.block_until_ready(z)
    kl = jax.block_until_ready(kl)

    z_ref, kl_ref = reference_forward(x, params, eps)
    assert z.shape == (B, LATENT_DIMS), "z shape mismatch"
    assert jnp.allclose(z, z_ref, atol=1e-5, rtol=1e-5), "z mismatch"
    assert jnp.allclose(kl, kl_ref, atol=1e-4, rtol=1e-5), "kl mismatch"

    print("KERNEL_OK")
</pallas_src>

<mosaic_0001>
module attributes {stable_mosaic.version = 11 : i64} {
  func.func @vae_encoder_kernel(%arg0: i32, %arg1: memref<8x32xf32, #tpu.memory_space<vmem>>, %arg2: memref<32x64xf32, #tpu.memory_space<vmem>>, %arg3: memref<1x64xf32, #tpu.memory_space<vmem>>, %arg4: memref<64x32xf32, #tpu.memory_space<vmem>>, %arg5: memref<1x32xf32, #tpu.memory_space<vmem>>, %arg6: memref<8x16xf32, #tpu.memory_space<vmem>>, %arg7: memref<8x16xf32, #tpu.memory_space<vmem>>, %arg8: memref<8x1xf32, #tpu.memory_space<vmem>>) attributes {dimension_semantics = [#tpu.dimension_semantics<parallel>], iteration_bounds = array<i64: 2>, scalar_prefetch = 0 : i64, scratch_operands = 0 : i64, tpu.core_type = #tpu.core_type<tc>, window_params = [{transform_indices = @transform_0, window_bounds = array<i64: 8, 32>}, {pipeline_mode = #tpu.pipeline_mode<synchronous>, transform_indices = @transform_1, window_bounds = array<i64: 32, 64>}, {pipeline_mode = #tpu.pipeline_mode<synchronous>, transform_indices = @transform_2, window_bounds = array<i64: 1, 64>}, {pipeline_mode = #tpu.pipeline_mode<synchronous>, transform_indices = @transform_3, window_bounds = array<i64: 64, 32>}, {pipeline_mode = #tpu.pipeline_mode<synchronous>, transform_indices = @transform_4, window_bounds = array<i64: 1, 32>}, {transform_indices = @transform_5, window_bounds = array<i64: 8, 16>}, {transform_indices = @transform_6, window_bounds = array<i64: 8, 16>}, {transform_indices = @transform_7, window_bounds = array<i64: 8, 1>}]} {
    %c0 = arith.constant 0 : index
    %c0_0 = arith.constant 0 : index
    %0 = vector.load %arg1[%c0, %c0_0] : memref<8x32xf32, #tpu.memory_space<vmem>>, vector<8x32xf32>
    %c0_1 = arith.constant 0 : index
    %c0_2 = arith.constant 0 : index
    %1 = vector.load %arg2[%c0_1, %c0_2] : memref<32x64xf32, #tpu.memory_space<vmem>>, vector<32x64xf32>
    %cst = arith.constant dense<0.000000e+00> : vector<8x64xf32>
    %2 = tpu.matmul %0, %1, %cst {dimension_numbers = #tpu.dot_dimension_numbers<[1], [0], [0], [1], [0, 0, 1, 1], [], []>} : vector<8x32xf32>, vector<32x64xf32>, vector<8x64xf32> -> vector<8x64xf32>
    %c0_3 = arith.constant 0 : index
    %c0_4 = arith.constant 0 : index
    %3 = vector.load %arg3[%c0_3, %c0_4] : memref<1x64xf32, #tpu.memory_space<vmem>>, vector<1x64xf32>
    %4 = vector.broadcast %3 : vector<1x64xf32> to vector<8x64xf32>
    %5 = arith.addf %2, %4 : vector<8x64xf32>
    %cst_5 = arith.constant 0.000000e+00 : f32
    %6 = vector.broadcast %cst_5 : f32 to vector<8x64xf32>
    %7 = arith.maximumf %5, %6 : vector<8x64xf32>
    %c0_6 = arith.constant 0 : index
    %c0_7 = arith.constant 0 : index
    %8 = vector.load %arg4[%c0_6, %c0_7] : memref<64x32xf32, #tpu.memory_space<vmem>>, vector<64x32xf32>
    %cst_8 = arith.constant dense<0.000000e+00> : vector<8x32xf32>
    %9 = tpu.matmul %7, %8, %cst_8 {dimension_numbers = #tpu.dot_dimension_numbers<[1], [0], [0], [1], [0, 0, 1, 1], [], []>} : vector<8x64xf32>, vector<64x32xf32>, vector<8x32xf32> -> vector<8x32xf32>
    %c0_9 = arith.constant 0 : index
    %c0_10 = arith.constant 0 : index
    %10 = vector.load %arg5[%c0_9, %c0_10] : memref<1x32xf32, #tpu.memory_space<vmem>>, vector<1x32xf32>
    %11 = vector.broadcast %10 : vector<1x32xf32> to vector<8x32xf32>
    %12 = arith.addf %9, %11 : vector<8x32xf32>
    %13 = vector.extract_strided_slice %12 {offsets = [0, 0], sizes = [8, 16], strides = [1, 1]} : vector<8x32xf32> to vector<8x16xf32>
    %14 = vector.extract_strided_slice %12 {offsets = [0, 16], sizes = [8, 16], strides = [1, 1]} : vector<8x32xf32> to vector<8x16xf32>
    %15 = math.exp %14 : vector<8x16xf32>
    %c0_11 = arith.constant 0 : index
    %c0_12 = arith.constant 0 : index
    %16 = vector.load %arg6[%c0_11, %c0_12] : memref<8x16xf32, #tpu.memory_space<vmem>>, vector<8x16xf32>
    %17 = arith.mulf %15, %16 : vector<8x16xf32>
    %18 = arith.addf %13, %17 : vector<8x16xf32>
    %c0_13 = arith.constant 0 : index
    %c0_14 = arith.constant 0 : index
    %19 = vector.load %arg7[%c0_13, %c0_14] : memref<8x16xf32, #tpu.memory_space<vmem>>, vector<8x16xf32>
    tpu.vector_store %arg7[%c0_13, %c0_14], %18 {strides = array<i32>} : memref<8x16xf32, #tpu.memory_space<vmem>>, vector<8x16xf32>,
    %20 = arith.mulf %15, %15 : vector<8x16xf32>
    %21 = arith.mulf %13, %13 : vector<8x16xf32>
    %22 = arith.addf %20, %21 : vector<8x16xf32>
    %23 = arith.subf %22, %14 : vector<8x16xf32>
    %cst_15 = arith.constant 5.000000e-01 : f32
    %24 = vector.broadcast %cst_15 : f32 to vector<8x16xf32>
    %25 = arith.subf %23, %24 : vector<8x16xf32>
    %cst_16 = arith.constant dense<0.000000e+00> : vector<8xf32>
    %26 = vector.multi_reduction <add>, %25, %cst_16 [1] : vector<8x16xf32> to vector<8xf32>
    %27 = vector.shape_cast %26 : vector<8xf32> to vector<8x1xf32>
    %c0_17 = arith.constant 0 : index
    %c0_18 = arith.constant 0 : index
    %28 = vector.load %arg8[%c0_17, %c0_18] : memref<8x1xf32, #tpu.memory_space<vmem>>, vector<8x1xf32>
    tpu.vector_store %arg8[%c0_17, %c0_18], %27 {strides = array<i32>} : memref<8x1xf32, #tpu.memory_space<vmem>>, vector<8x1xf32>,
    return
  }
  func.func @transform_0(%arg0: i32) -> (i32, i32) {
    %c0_i32 = arith.constant 0 : i32
    %c0_i32_0 = arith.constant 0 : i32
    return %arg0, %c0_i32 : i32, i32
  }
  func.func @transform_1(%arg0: i32) -> (i32, i32) {
    %c0_i32 = arith.constant 0 : i32
    %c0_i32_0 = arith.constant 0 : i32
    %c0_i32_1 = arith.constant 0 : i32
    return %c0_i32, %c0_i32_0 : i32, i32
  }
  func.func @transform_2(%arg0: i32) -> (i32, i32) {
    %c0_i32 = arith.constant 0 : i32
    %c0_i32_0 = arith.constant 0 : i32
    %c0_i32_1 = arith.constant 0 : i32
    return %c0_i32, %c0_i32_0 : i32, i32
  }
  func.func @transform_3(%arg0: i32) -> (i32, i32) {
    %c0_i32 = arith.constant 0 : i32
    %c0_i32_0 = arith.constant 0 : i32
    %c0_i32_1 = arith.constant 0 : i32
    return %c0_i32, %c0_i32_0 : i32, i32
  }
  func.func @transform_4(%arg0: i32) -> (i32, i32) {
    %c0_i32 = arith.constant 0 : i32
    %c0_i32_0 = arith.constant 0 : i32
    %c0_i32_1 = arith.constant 0 : i32
    return %c0_i32, %c0_i32_0 : i32, i32
  }
  func.func @transform_5(%arg0: i32) -> (i32, i32) {
    %c0_i32 = arith.constant 0 : i32
    %c0_i32_0 = arith.constant 0 : i32
    return %arg0, %c0_i32 : i32, i32
  }
  func.func @transform_6(%arg0: i32) -> (i32, i32) {
    %c0_i32 = arith.constant 0 : i32
    %c0_i32_0 = arith.constant 0 : i32
    return %arg0, %c0_i32 : i32, i32
  }
  func.func @transform_7(%arg0: i32) -> (i32, i32) {
    %c0_i32 = arith.constant 0 : i32
    %c0_i32_0 = arith.constant 0 : i32
    return %arg0, %c0_i32 : i32, i32
  }
}

</mosaic_0001>

<bundles_post_ra>
// kernel: tpu_custom_call.1
= control target key start
LH: loop header
LB: loop body
LE: loop exit
PB: predicated region body
PF: predicated region fallthrough
CT: control target
= control target key end

     0   :  { %13 = vsyncpa [#allocation3], 0  ;;  %s827_s0 = inlined_call_operand.vmem [shape: f32[16,32], index: 0, kind: input, shape index: {}]   ;;  %s828_s1 = inlined_call_operand.vmem [shape: f32[32,64], index: 1, kind: input, shape index: {}]   ;;  %s829_s2 = inlined_call_operand.vmem [shape: f32[1,64], index: 2, kind: input, shape index: {}]   ;;  %s830_s3 = inlined_call_operand.vmem [shape: f32[64,32], index: 3, kind: input, shape index: {}]   ;;  %s831_s4 = inlined_call_operand.vmem [shape: f32[1,32], index: 4, kind: input, shape index: {}]   ;;  %s832_s5 = inlined_call_operand.vmem [shape: f32[16,16], index: 5, kind: input, shape index: {}]   ;;  %s833_s6 = inlined_call_operand.hbm [shape: f32[16,16], index: 6, kind: output, shape index: {0}]   ;;  %s834_s7 = inlined_call_operand.vmem [shape: f32[16,1], index: 7, kind: output, shape index: {1}]  }
   0x1   :  { %15 = vsyncpa [#allocation3 + $0x1], 0  ;;  %s689_s24 = smov 0   ;;  %s691_s25 = smov 0  }
   0x2   :  { %s693_s26 = smov 0   ;;  %s695_s27 = smov 0  }
   0x3 LB: > { %s710_s28 = sadd.s32 4294967295, %s645_s27   ;;  %s523_s29 = sadd.s32 4294967294, %s645_s27   ;;  %s645_s27 = sphi %s695_s27, %s840_s27   ;;  %s641_s26 = sphi %s693_s26, %s839_s26   ;;  %s637_s25 = sphi %s691_s25, %s838_s25   ;;  %s633_s24 = sphi %s689_s24, %s837_s24  }
   0x4   : > { %s714_s30 = sadd.s32 1, %s645_s27   ;;  %s164_s8 = sadd.s32 1, %s641_s26 }
   0x5   : > { %s161_s9 = ssub.s32 %s645_s27, %s714_s30  ;;  %p174_p0 = scmp.ne.s32.totalorder %s641_s26, %s637_s25 }
   0x6   : > { %p162_p1 = scmp.eq.s32.totalorder %s161_s9, 0  ;;  %p175_p2 = scmp.eq.s32.totalorder %s710_s28, 1 }
   0x7   : > { %p180_p3 = scmp.ne.s32.totalorder %s637_s25, %s633_s24  ;;  %p181_p4 = scmp.eq.s32.totalorder %s523_s29, 1 }
   0x8   : > { %s725_s10 = scalar_select %p162_p1, %s641_s26, %s164_s8  }
   0x9   : > { %p727_p5 = por %p175_p2, %p174_p0  ;;  %p731_p6 = por %p181_p4, %p180_p3 }
   0xa   : > { %p526_p7 = scmp.ge.s32.totalorder %s645_s27, 1  ;;  %p251_p8 = scmp.lt.s32.totalorder %s645_s27, 3 }
   0xc   : > { %p252_p9 = pnand %p526_p7, %p251_p8 }
   0xd   : > { %p290_p10 = scmp.lt.s32.totalorder (!%p252_p9), %s710_s28, 1  ;;  %s647_s19 = smov (!%p252_p9), 16  }
   0xe   : > { %255 = sbr.rel (%p252_p9) target bundleno = 641 (0x281), region = 44  ;;  %s281_s29 = sand.u32 (!%p252_p9), 1, %s637_s25  }
   0xf   : > { %s535_s8 = sshll.u32 (!%p252_p9), %s710_s28, 3  ;;  %s527_s9 = sshll.u32 (!%p252_p9), %s281_s29, 3 }
  0x10   : > { %s420_s16 = scalar_lea.hbm (!%p252_p9), %s833_s6, %s535_s8  ;;  %s406_s20 = scalar_lea.sflag (!%p252_p9), [#allocation3], %s281_s29 }
  0x11   : > { %s603_s8 = scalar_lea.hbm (!%p252_p9), %s833_s6, 16 }
  0x13   : > { %v306_v0 = vld [vmem:[%s828_s1 + $0x18] sm:$0xff]  ;;  %v305_v1 = vld [vmem:[%s828_s1 + $0x10] sm:$0xff]  ;;  %v304_v4 = vld [vmem:[%s828_s1 + $0x8] sm:$0xff]  ;;  %s291_s23 = scalar_select %p290_p10, %s710_s28, 1  ;;  %vm311_vm0 = vcmask 261120   ;;  %vm348_vm1 = vcmask 523264  }
  0x14   : > { %327 = vmatpush.msra.mxu0 %v306_v0  ;;  %v343_v2 = vld [vmem:[%s830_s3 + $0x38] sm:$0xff]  ;;  %v342_v3 = vld [vmem:[%s830_s3 + $0x30] sm:$0xff]  ;;  %v341_v5 = vld [vmem:[%s830_s3 + $0x28] sm:$0xff]  ;;  %vm385_vm2 = vcmask 130048  }
  0x15   : > { %360 = vmatpush.msra.mxu1 %v343_v2  ;;  %v303_v6 = vld [vmem:[%s828_s1] sm:$0xff]  ;;  %s760_s14 = sshll.u32 %s291_s23, 3  ;;  %v339_v9 = vld [vmem:[%s830_s3 + $0x18] sm:$0xff]  ;;  %v338_v10 = vld [vmem:[%s830_s3 + $0x10] sm:$0xff]  ;;  %s648_s23 = smov 112  }
  0x16   : > { %328 = vmatpush.msra.mxu0 %v305_v1  ;;  %s293_s17 = scalar_lea.vmem %s827_s0, %s760_s14  ;;  %v340_v7 = vld [vmem:[%s830_s3 + $0x20] sm:$0xff]  ;;  %v337_v11 = vld [vmem:[%s830_s3 + $0x8] sm:$0xff]  ;;  %s297_s22 = scalar_lea.vmem %s832_s5, %s760_s14 }
  0x17   : > { %361 = vmatpush.msra.mxu1 %v342_v3  ;;  %v302_v8 = vld [vmem:[%s293_s17] sm:$0xff]  ;;  %s283_s17 = scalar_lea.vmem [#allocation2], %s527_s9 }
  0x18   : > { %329 = vmatpush.msra.mxu0 %v304_v4  ;;  %v336_v12 = vld [vmem:[%s830_s3] sm:$0xff]  ;;  %s422_s18 = sshll.u32 %s283_s17, 4  ;;  %s423_s18 = int_to_ptr.vmem [resolvable:$true] %s422_s18 }
  0x19   : > { %362 = vmatpush.msra.mxu1 %v341_v5  ;;  %v579_v13 = vld [vmem:[%s829_s2] ss:$0 sm:$0xff] }
  0x1a   : > { %330 = vmatpush.msra.mxu0 %v303_v6  ;;  %v580_v17 = vld [vmem:[%s831_s4] ss:$0 sm:$0xff] }
  0x1b   : > { %531 = vmatmul.msk.f32.vlgmr.msra.gmra.mxu0 %vm311_vm0, %v302_v8  ;;  %363 = vmatpush.msra.mxu1 %v340_v7  ;;  %v374_v21 = vld [vmem:[%s297_s22] sm:$0xff] }
  0x1d   : > { %364 = vmatpush.msra.mxu1 %v339_v9 }
  0x1f   : > { %365 = vmatpush.msra.mxu1 %v338_v10 }
  0x21   : > { %366 = vmatpush.msra.mxu1 %v337_v11 }
  0x23   : > { %367 = vmatpush.msra.mxu1 %v336_v12 }
  0x98   : > { %v332_v14 = vpop.f32.mrf.mxu0 }
  0x99   : > { %v333_v15 = vadd.f32 %v579_v13, %v332_v14 }
  0x9b   : > { %v335_v16 = vmax.f32 %v333_v15, 0.0 }
  0x9d   : > { %532 = vmatmul.msk.f32.vlgmr.msra.gmra.mxu1 %vm348_vm1, %v335_v16 }
 0x11a   : > { %v369_v18 = vpop.f32.mrf.mxu1 }
 0x11b   : > { %v370_v19 = vadd.f32 %v580_v17, %v369_v18 }
 0x11d   : > { %v388_v20 = vmul.f32 %v370_v19, %v370_v19  ;;  %v372_v22 = vmul.f32 1.442695, %v370_v19 }
 0x11f   : > { %390 = vrot.lane.b32.xlu0 %v388_v20, %s647_s19  ;;  %581 = vpow2.f32 %v372_v22 }
 0x125   : > { %v582_v23 = vpop.eup %581 }
 0x126   : > { %v387_v24 = vmul.f32 %v582_v23, %v582_v23 }
 0x127   : > { %376 = vrot.lane.b32.xlu0 %v374_v21, %s647_s19  ;;  %s424_s19 = sshll.u32 %s420_s16, 4  ;;  %s425_s19 = int_to_ptr.hbm [resolvable:$true] %s424_s19 }
 0x128   : > { %s597_s21 = sshra.s32 %s425_s19, 4  ;;  %s598_s21 = int_to_ptr.hbm [resolvable:$true] %s597_s21 }
 0x129   : > { %s599_s28 = scalar_lea.hbm %s598_s21, 8  ;;  %p604_p0 = scmp.lt.s32.totalorder %s598_s21, %s833_s6 }
 0x12a   : > { %p600_p11 = scmp.ne.s32.totalorder %s598_s21, %s599_s28  ;;  %p605_p1 = scmp.lt.s32.totalorder %s603_s8, %s599_s28 }
 0x12c   : > { %p601_p12 = pnand %p600_p11, %p727_p5  ;;  %p606_p2 = por %p605_p1, %p604_p0 }
 0x12e   : > { %p602_p13 = pneg %p601_p12 }
 0x130   : > { %p607_p3 = pnand %p606_p2, %p602_p13 }
 0x191   : > { %v391_v25 = vpop.permute.xlu0 %390 }
 0x192   : > { %v393_v26 = vadd.f32 %v391_v25, %v387_v24 }
 0x194   : > { %v394_v27 = vsub.f32 %v393_v26, %v370_v19 }
 0x196   : > { %v533_v28 = vadd.f32 -0.5, %v394_v27 }
 0x198   : > { %397 = vrot.lane.b32.xlu1 %v533_v28, %s648_s23 }
 0x199   : > { %v377_v29 = vpop.permute.xlu0 %376 }
 0x19a   : > { %v379_v30 = vmul.f32 %v582_v23, %v377_v29 }
 0x1a0   : > { %381 = vrot.lane.b32.xlu1 %v379_v30, %s648_s23 }
 0x20a   : > { %v398_v31 = vpop.permute.xlu1 %397 }
 0x20b   : > { %v400_v32 = vsel %vm385_vm2, %v398_v31, 0.0 }
 0x20c   : > { %401 = vadd.xlane.f32.xlu2 %v400_v32 }
 0x212   : > { %v382_v33 = vpop.permute.xlu1 %381 }
 0x213   : > { %v384_v34 = vadd.f32 %v382_v33, %v370_v19 }
 0x215   : > { %386 = vst.msk [vmem:[%s283_s17] sm:$0xff] %vm385_vm2, %v384_v34 }
 0x216   : > { %610 = shalt.err (!%p607_p3)
}
 0x217   : > { %538 = dma.vmem_to_hbm [thread:$0]  (%p727_p5), %s423_s18, 128, %s425_s19, %s406_s20   ;;  %vm403_vm3 = vcmask 7168  }
 0x218   : > { %s301_s16 = scalar_lea.vmem %s834_s7, %s760_s14 }
 0x27f   : > { %v402_v35 = vpop.xlane.xlu2 %401 }
 0x280   : > { %404 = vst.msk [vmem:[%s301_s16] sm:$0xff] %vm403_vm3, %v402_v35 }
 0x281 PF: > { %p544_p4 = scmp.ge.s32.totalorder %s645_s27, 2  ;;  %s439_s17 = sand.u32 1, %s633_s24  }
 0x282   : > { %s440_s21 = scalar_lea.sflag [#allocation3], %s439_s17 }
 0x283   : > { %p541_p7 = pnand %p544_p4, %p731_p6 }
 0x285   : > { %p542_p8 = pneg %p541_p7 }
 0x287   : > { %628 = dma.done.wait (%p542_p8), %s440_s21, 128  }
 0x288   : > { %630 = vsyncadd (%p542_p8), %s440_s21, 4294967168  ;;  %p18_p5 = scmp.ge.s32.totalorder %s714_s30, 4   ;;  %s837_s24 = smov %s637_s25 }
 0x289   : > { %s838_s25 = smov %s641_s26  ;;  %s839_s26 = smov %s725_s10 }
 0x28a   : > { %s840_s27 = smov %s714_s30  ;;  %20 = sbr.rel (!%p18_p5) target bundleno = 3 (0x3), region = 94 }
 0x28f   :  { %453 = vsyncpa [#allocation3], 1 }
 0x290   :  { %455 = vsyncpa [#allocation3 + $0x1], 1 }

</bundles_post_ra>
